<compile_context>
chip_gen: v7x
topology: tpu7x:2x2x1
jax: 0.10.0
libtpu: 0.0.40
codegen_flags: <defaults>
</compile_context>

<pallas_src>
import functools

import jax
import jax.numpy as jnp
from jax import lax
from jax.experimental import pallas as pl
from jax.experimental.pallas import tpu as pltpu


def _vmem_budget_bytes():
    """Per-generation VMEM budget: ~75% of capacity, capped at 96 MiB.

    v5e/v6e (128 MiB) -> 96 MiB; v7x (64 MiB per TensorCore) -> 48 MiB.
    """
    try:
        cap = int(pltpu.get_tpu_info().vmem_capacity_bytes)
    except Exception:  # fall back to the most restrictive generation (v7x)
        cap = 64 * 1024 * 1024
    return min(cap * 3 // 4, 96 * 1024 * 1024)


def _pick_tile_t(T, D, K, vmem_budget, resident_bytes):
    """Largest T-tile whose live set fits the VMEM budget.

    Live bytes per T-column: x + x_d tiles (f32, double-buffered) = 16*D, plus
    ~4 (K, tT) f32 temporaries (score / one-hot / selects) = 16*K.
    """
    per_col = 16 * D + 16 * K
    avail = max(vmem_budget - resident_bytes - (4 << 20), 1 << 20)
    tt = 4096
    while tt > 128 and tt * per_col > avail:
        tt //= 2
    # If the whole T axis fits, use it (block == full dim is always legal);
    # otherwise tt is a multiple of 128 and the last block overruns + masks.
    return T if tt >= T else tt


def _const_spec(shape):
    """Grid-invariant (VMEM-resident) block; single-buffered when supported."""
    index_map = lambda n, t: (0,) * len(shape)
    try:
        return pl.BlockSpec(shape, index_map, pipeline_mode=pl.Buffered(1))
    except Exception:  # older jax without BlockSpec(pipeline_mode=...)
        return pl.BlockSpec(shape, index_map)


def _vq_kernel(x_ref, cb_ref, cbt_ref, c2_ref, xd_ref, part_ref,
               *, t_total, needs_mask):
    x = x_ref[0]                                              # (D, tT) f32, T lane-dense
    d, tt = x.shape
    k = cb_ref.shape[0]

    # --- distance / nearest code -----------------------------------------
    # argmin_k |x - c_k|^2 == argmin_k (0.5*|c_k|^2 - c_k . x)
    xc = jnp.dot(cb_ref[...], x.astype(jnp.bfloat16),
                 preferred_element_type=jnp.float32)          # (K, tT) bf16 MXU
    score = c2_ref[...] - xc                                  # (K,1) bcast -> (K, tT)

    k_iota = lax.broadcasted_iota(jnp.int32, (k, tt), 0).astype(jnp.float32)
    min_val = jnp.min(score, axis=0, keepdims=True)           # (1, tT)
    # first-match tie-break to match torch.min; invalid (garbage/NaN) columns
    # never match -> idx == K -> all-zero one-hot column.
    idx = jnp.min(jnp.where(score == min_val, k_iota, float(k)),
                  axis=0, keepdims=True)                      # (1, tT)
    one_hot = (k_iota == idx).astype(jnp.float32)             # (K, tT)

    # --- dequantize: exact f32 codebook rows (cb^T @ one-hot on the MXU) --
    x_d = jnp.dot(cbt_ref[...], one_hot,
                  preferred_element_type=jnp.float32)         # (D, tT)
    xd_ref[0] = x_d.astype(xd_ref.dtype)

    # --- per-tile partials: per-code counts + sum of squared error --------
    if needs_mask:
        t0 = pl.program_id(1) * tt
        valid_row = (t0 + lax.broadcasted_iota(jnp.int32, (1, tt), 1)) < t_total
        valid_col = ((t0 + lax.broadcasted_iota(jnp.int32, (tt, 1), 0))
                     < t_total).astype(jnp.float32)           # (tT, 1)
        diff = jnp.where(valid_row, x - x_d, 0.0)             # kill NaN garbage cols
    else:
        valid_col = jnp.ones((tt, 1), jnp.float32)
        diff = x - x_d

    counts = jnp.dot(one_hot, valid_col,
                     preferred_element_type=jnp.float32)      # (K, 1) on the MXU
    sq = jnp.sum(diff * diff)                                 # scalar

    # Pack counts (lane 0) and the squared-error scalar (lanes 1..7) into one
    # tiny (K, 8) output block -> a single small per-step output DMA.
    lane = lax.broadcasted_iota(jnp.int32, (k, 8), 1)
    part_ref[0, 0] = jnp.where(lane == 0, counts, sq)


def quantize_ema_reset_forward(x, codebook):
    """Eval-mode forward of QuantizeEMAReset.

    x:        (N, code_dim, T) float
    codebook: (nb_code, code_dim) float
    returns:  (x_d (N, code_dim, T) f32, commit_loss scalar, perplexity scalar)
    """
    N, D, T = x.shape
    K = codebook.shape[0]
    M = N * T

    x_f32 = x.astype(jnp.float32)
    cb_f32 = codebook.astype(jnp.float32)                         # (K, D) exact dequant table
    cb_bf16 = cb_f32.astype(jnp.bfloat16)                         # (K, D) distance matmul LHS
    cbt_f32 = jnp.transpose(cb_f32)                               # (D, K) dequant matmul LHS
    c2_half = 0.5 * jnp.sum(cb_f32 * cb_f32, axis=-1, keepdims=True)  # (K, 1)

    # Resident codebook footprint (single-buffered); c2 pads lanes to 128.
    resident = K * D * 2 + K * D * 4 + K * 128 * 4
    budget = _vmem_budget_bytes()
    tt = _pick_tile_t(T, D, K, budget, resident)
    grid_t = pl.cdiv(T, tt)
    needs_mask = (grid_t * tt != T)

    kernel = functools.partial(_vq_kernel, t_total=T, needs_mask=needs_mask)

    x_d, partials = pl.pallas_call(
        kernel,
        grid=(N, grid_t),
        in_specs=[
            pl.BlockSpec((1, D, tt), lambda n, t: (n, 0, t)),      # x tile (streamed)
            _const_spec((K, D)),                                   # codebook bf16 (resident)
            _const_spec((D, K)),                                   # codebook^T f32 (resident)
            _const_spec((K, 1)),                                   # 0.5*|c|^2     (resident)
        ],
        out_specs=(
            pl.BlockSpec((1, D, tt), lambda n, t: (n, 0, t)),      # x_d tile (native layout)
            pl.BlockSpec((1, 1, K, 8), lambda n, t: (n, t, 0, 0)), # per-tile partials
        ),
        out_shape=(
            jax.ShapeDtypeStruct((N, D, T), jnp.float32),
            jax.ShapeDtypeStruct((N, grid_t, K, 8), jnp.float32),
        ),
        compiler_params=pltpu.CompilerParams(
            dimension_semantics=("parallel", "parallel"),          # megacore on v7x
            vmem_limit_bytes=budget,
        ),
    )(x_f32, cb_bf16, cbt_f32, c2_half)

    # commit_loss = F.mse_loss(x, x_d.detach()) -> mean over all M*D elements.
    code_count = jnp.sum(partials[..., 0], axis=(0, 1))            # (K,)
    sq_err = jnp.sum(partials[:, :, 0, 1])
    commit_loss = sq_err / (M * D)

    # perplexity (eval path: compute_perplexity)
    prob = code_count / jnp.sum(code_count)
    perplexity = jnp.exp(-jnp.sum(prob * jnp.log(prob + 1e-7)))

    # straight-through: forward value is x_d itself, already in (N, D, T).
    return x_d, commit_loss, perplexity


if __name__ == "__main__":
    N, code_dim, T = 2, 32, 16
    nb_code = 128

    key = jax.random.PRNGKey(0)
    kx, kc = jax.random.split(key)
    x = jax.random.normal(kx, (N, code_dim, T), dtype=jnp.float32)
    # deterministic synthetic codebook (module buffer is (nb_code, code_dim))
    codebook = jax.random.normal(kc, (nb_code, code_dim), dtype=jnp.float32)

    x_d, commit_loss, perplexity = quantize_ema_reset_forward(x, codebook)
    jax.block_until_ready((x_d, commit_loss, perplexity))

    assert x_d.shape == (N, code_dim, T)
    assert commit_loss.shape == () and perplexity.shape == ()
    assert bool(jnp.isfinite(commit_loss)) and bool(jnp.isfinite(perplexity))

    # Invariant: every dequantized column must be a (near-)exact codebook row.
    cols = jnp.transpose(x_d, (0, 2, 1)).reshape(-1, code_dim)     # (M, D)
    d2 = (jnp.sum(cols * cols, axis=-1, keepdims=True)
          - 2.0 * cols @ codebook.T
          + jnp.sum(codebook * codebook, axis=-1)[None, :])
    assert float(jnp.max(jnp.min(d2, axis=-1))) < 1e-3

    print("KERNEL_OK")
</pallas_src>

<mosaic_0001>
module attributes {stable_mosaic.version = 11 : i64} {
  func.func @_vq_kernel(%arg0: i32, %arg1: i32, %arg2: memref<1x32x16xf32, #tpu.memory_space<vmem>>, %arg3: memref<128x32xbf16, #tpu.memory_space<vmem>>, %arg4: memref<32x128xf32, #tpu.memory_space<vmem>>, %arg5: memref<128x1xf32, #tpu.memory_space<vmem>>, %arg6: memref<1x32x16xf32, #tpu.memory_space<vmem>>, %arg7: memref<1x1x128x8xf32, #tpu.memory_space<vmem>>) attributes {dimension_semantics = [#tpu.dimension_semantics<parallel>, #tpu.dimension_semantics<parallel>], iteration_bounds = array<i64: 2, 1>, scalar_prefetch = 0 : i64, scratch_operands = 0 : i64, tpu.core_type = #tpu.core_type<tc>, window_params = [{transform_indices = @transform_0, window_bounds = array<i64: 1, 32, 16>}, {pipeline_mode = #tpu.pipeline_mode<synchronous>, transform_indices = @transform_1, window_bounds = array<i64: 128, 32>}, {pipeline_mode = #tpu.pipeline_mode<synchronous>, transform_indices = @transform_2, window_bounds = array<i64: 32, 128>}, {pipeline_mode = #tpu.pipeline_mode<synchronous>, transform_indices = @transform_3, window_bounds = array<i64: 128, 1>}, {transform_indices = @transform_4, window_bounds = array<i64: 1, 32, 16>}, {transform_indices = @transform_5, window_bounds = array<i64: 1, 1, 128, 8>}]} {
    %c0 = arith.constant 0 : index
    %c0_0 = arith.constant 0 : index
    %c0_1 = arith.constant 0 : index
    %0 = vector.load %arg2[%c0, %c0_0, %c0_1] : memref<1x32x16xf32, #tpu.memory_space<vmem>>, vector<1x32x16xf32>
    %1 = vector.shape_cast %0 : vector<1x32x16xf32> to vector<32x16xf32>
    %c0_2 = arith.constant 0 : index
    %c0_3 = arith.constant 0 : index
    %2 = vector.load %arg3[%c0_2, %c0_3] : memref<128x32xbf16, #tpu.memory_space<vmem>>, vector<128x32xbf16>
    %3 = arith.truncf %1 : vector<32x16xf32> to vector<32x16xbf16>
    %cst = arith.constant dense<0.000000e+00> : vector<128x16xf32>
    %4 = tpu.matmul %2, %3, %cst {dimension_numbers = #tpu.dot_dimension_numbers<[1], [0], [0], [1], [0, 0, 1, 1], [], []>} : vector<128x32xbf16>, vector<32x16xbf16>, vector<128x16xf32> -> vector<128x16xf32>
    %c0_4 = arith.constant 0 : index
    %c0_5 = arith.constant 0 : index
    %5 = vector.load %arg5[%c0_4, %c0_5] : memref<128x1xf32, #tpu.memory_space<vmem>>, vector<128x1xf32>
    %6 = vector.broadcast %5 : vector<128x1xf32> to vector<128x16xf32>
    %7 = arith.subf %6, %4 : vector<128x16xf32>
    %8 = tpu.iota {dimensions = array<i32: 0>} : vector<128x16xi32>
    %9 = arith.sitofp %8 : vector<128x16xi32> to vector<128x16xf32>
    %cst_6 = arith.constant dense<0x7F800000> : vector<16xf32>
    %10 = vector.multi_reduction <minimumf>, %7, %cst_6 [0] : vector<128x16xf32> to vector<16xf32>
    %11 = vector.shape_cast %10 : vector<16xf32> to vector<1x16xf32>
    %12 = vector.broadcast %11 : vector<1x16xf32> to vector<128x16xf32>
    %13 = arith.cmpf oeq, %7, %12 : vector<128x16xf32>
    %cst_7 = arith.constant 1.280000e+02 : f32
    %14 = vector.broadcast %cst_7 : f32 to vector<128x16xf32>
    %15 = arith.select %13, %9, %14 : vector<128x16xi1>, vector<128x16xf32>
    %cst_8 = arith.constant dense<0x7F800000> : vector<16xf32>
    %16 = vector.multi_reduction <minimumf>, %15, %cst_8 [0] : vector<128x16xf32> to vector<16xf32>
    %17 = vector.shape_cast %16 : vector<16xf32> to vector<1x16xf32>
    %18 = vector.broadcast %17 : vector<1x16xf32> to vector<128x16xf32>
    %19 = arith.cmpf oeq, %9, %18 : vector<128x16xf32>
    %20 = arith.extui %19 : vector<128x16xi1> to vector<128x16xi32>
    %21 = arith.sitofp %20 : vector<128x16xi32> to vector<128x16xf32>
    %c0_9 = arith.constant 0 : index
    %c0_10 = arith.constant 0 : index
    %22 = vector.load %arg4[%c0_9, %c0_10] : memref<32x128xf32, #tpu.memory_space<vmem>>, vector<32x128xf32>
    %cst_11 = arith.constant dense<0.000000e+00> : vector<32x16xf32>
    %23 = tpu.matmul %22, %21, %cst_11 {dimension_numbers = #tpu.dot_dimension_numbers<[1], [0], [0], [1], [0, 0, 1, 1], [], []>} : vector<32x128xf32>, vector<128x16xf32>, vector<32x16xf32> -> vector<32x16xf32>
    %c0_12 = arith.constant 0 : index
    %c0_13 = arith.constant 0 : index
    %c0_14 = arith.constant 0 : index
    %24 = vector.load %arg6[%c0_12, %c0_13, %c0_14] : memref<1x32x16xf32, #tpu.memory_space<vmem>>, vector<1x32x16xf32>
    %25 = vector.shape_cast %24 : vector<1x32x16xf32> to vector<32x16xf32>
    %26 = vector.shape_cast %23 : vector<32x16xf32> to vector<1x32x16xf32>
    tpu.vector_store %arg6[%c0_12, %c0_13, %c0_14], %26 {strides = array<i32>} : memref<1x32x16xf32, #tpu.memory_space<vmem>>, vector<1x32x16xf32>,
    %cst_15 = arith.constant 1.000000e+00 : f32
    %27 = vector.broadcast %cst_15 : f32 to vector<16x1xf32>
    %28 = arith.subf %1, %23 : vector<32x16xf32>
    %cst_16 = arith.constant dense<0.000000e+00> : vector<128x1xf32>
    %29 = tpu.matmul %21, %27, %cst_16 {dimension_numbers = #tpu.dot_dimension_numbers<[1], [0], [0], [1], [0, 0, 1, 1], [], []>} : vector<128x16xf32>, vector<16x1xf32>, vector<128x1xf32> -> vector<128x1xf32>
    %30 = arith.mulf %28, %28 : vector<32x16xf32>
    %31 = vector.shape_cast %30 : vector<32x16xf32> to vector<1x32x16xf32>
    %cst_17 = arith.constant dense<0.000000e+00> : vector<1xf32>
    %32 = vector.multi_reduction <add>, %31, %cst_17 [1, 2] : vector<1x32x16xf32> to vector<1xf32>
    %33 = vector.shape_cast %32 : vector<1xf32> to vector<1x1x1xf32>
    %34 = vector.extract %33[0, 0, 0] : f32 from vector<1x1x1xf32>
    %35 = tpu.iota {dimensions = array<i32: 1>} : vector<128x8xi32>
    %c0_i32 = arith.constant 0 : i32
    %36 = vector.broadcast %c0_i32 : i32 to vector<128x8xi32>
    %37 = arith.cmpi eq, %35, %36 : vector<128x8xi32>
    %38 = vector.shape_cast %29 : vector<128x1xf32> to vector<128x1xf32>
    %39 = vector.broadcast %38 : vector<128x1xf32> to vector<128x8xf32>
    %40 = vector.broadcast %34 : f32 to vector<128x8xf32>
    %41 = arith.select %37, %39, %40 : vector<128x8xi1>, vector<128x8xf32>
    %c0_18 = arith.constant 0 : index
    %c0_19 = arith.constant 0 : index
    %c0_20 = arith.constant 0 : index
    %c0_21 = arith.constant 0 : index
    %42 = vector.load %arg7[%c0_18, %c0_19, %c0_20, %c0_21] : memref<1x1x128x8xf32, #tpu.memory_space<vmem>>, vector<1x1x128x8xf32>
    %43 = vector.shape_cast %42 : vector<1x1x128x8xf32> to vector<128x8xf32>
    %44 = vector.shape_cast %41 : vector<128x8xf32> to vector<1x1x128x8xf32>
    tpu.vector_store %arg7[%c0_18, %c0_19, %c0_20, %c0_21], %44 {strides = array<i32>} : memref<1x1x128x8xf32, #tpu.memory_space<vmem>>, vector<1x1x128x8xf32>,
    return
  }
  func.func @transform_0(%arg0: i32, %arg1: i32) -> (i32, i32, i32) {
    %c0_i32 = arith.constant 0 : i32
    %c0_i32_0 = arith.constant 0 : i32
    return %arg0, %c0_i32, %arg1 : i32, i32, i32
  }
  func.func @transform_1(%arg0: i32, %arg1: i32) -> (i32, i32) {
    %c0_i32 = arith.constant 0 : i32
    %c0_i32_0 = arith.constant 0 : i32
    %c0_i32_1 = arith.constant 0 : i32
    return %c0_i32, %c0_i32_0 : i32, i32
  }
  func.func @transform_2(%arg0: i32, %arg1: i32) -> (i32, i32) {
    %c0_i32 = arith.constant 0 : i32
    %c0_i32_0 = arith.constant 0 : i32
    %c0_i32_1 = arith.constant 0 : i32
    return %c0_i32, %c0_i32_0 : i32, i32
  }
  func.func @transform_3(%arg0: i32, %arg1: i32) -> (i32, i32) {
    %c0_i32 = arith.constant 0 : i32
    %c0_i32_0 = arith.constant 0 : i32
    %c0_i32_1 = arith.constant 0 : i32
    return %c0_i32, %c0_i32_0 : i32, i32
  }
  func.func @transform_4(%arg0: i32, %arg1: i32) -> (i32, i32, i32) {
    %c0_i32 = arith.constant 0 : i32
    %c0_i32_0 = arith.constant 0 : i32
    return %arg0, %c0_i32, %arg1 : i32, i32, i32
  }
  func.func @transform_5(%arg0: i32, %arg1: i32) -> (i32, i32, i32, i32) {
    %c0_i32 = arith.constant 0 : i32
    %c0_i32_0 = arith.constant 0 : i32
    %c0_i32_1 = arith.constant 0 : i32
    return %arg0, %arg1, %c0_i32, %c0_i32_0 : i32, i32, i32, i32
  }
}

</mosaic_0001>

<bundles_post_ra>
// kernel: tpu_custom_call.1
= control target key start
LH: loop header
LB: loop body
LE: loop exit
PB: predicated region body
PF: predicated region fallthrough
CT: control target
= control target key end

     0   :  { %s1671_s18 = smov 0   ;;  %s1673_s19 = smov 0   ;;  %s2190_s0 = inlined_call_operand.vmem [shape: f32[2,32,16], index: 0, kind: input, shape index: {}]   ;;  %s2191_s1 = inlined_call_operand.vmem [shape: bf16[128,32], index: 1, kind: input, shape index: {}]   ;;  %s2192_s2 = inlined_call_operand.vmem [shape: f32[32,128], index: 2, kind: input, shape index: {}]   ;;  %s2193_s3 = inlined_call_operand.vmem [shape: f32[128,1], index: 3, kind: input, shape index: {}]   ;;  %s2194_s4 = inlined_call_operand.vmem [shape: f32[2,32,16], index: 4, kind: output, shape index: {0}]   ;;  %s2195_s5 = inlined_call_operand.vmem [shape: f32[2,1,128,8], index: 5, kind: output, shape index: {1}]  }
   0x1   :  { %s1675_s20 = smov 0  }
   0x2 LB: > { %s28_s21 = sadd.s32 1, %s1632_s19  ;;  %p1331_p0 = scmp.ge.s32.totalorder %s1636_s20, 1  ;;  %s1636_s20 = sphi %s1675_s20, %s16_s20   ;;  %s1632_s19 = sphi %s1673_s19, %s2201_s19   ;;  %s1628_s18 = sphi %s1671_s18, %s2200_s18  }
   0x3   : > { %p30_p1 = scmp.ge.s32.totalorder %s28_s21, 2  ;;  %p211_p2 = scmp.lt.s32.totalorder %s1636_s20, 3 }
   0x5   : > { %s2203_s21 = smov (%p30_p1, %s28_s21), 0  ;;  %p212_p3 = pnand %p1331_p0, %p211_p2 }
   0x6   : > { %p254_p4 = scmp.lt.s32.totalorder (!%p212_p3), %s1628_s18, 1  ;;  %v1606_v0 = vld [vmem:[%s2191_s1] sm:$0xff] (!%p212_p3)   ;;  %vm342_vm0 = vcmask (!%p212_p3), 261120   ;;  %v1638_v1 = vmov (!%p212_p3), 0   ;;  %v466_v8 = vld [vmem:[%s2193_s3 + $0x10] sm:$0xff] (!%p212_p3)  ;;  %v467_v10 = vld [vmem:[%s2193_s3 + $0x18] sm:$0xff] (!%p212_p3) }
   0x7   : > { %215 = sbr.rel (%p212_p3) target bundleno = 797 (0x31d), region = 36  ;;  %1459 = vmatprep.mubr.msk.bf16.mxu1 (!%p212_p3), %vm342_vm0, %v1606_v0  ;;  %1605 = vset.pattern.permute.xlu1 (!%p212_p3), %v1638_v1  ;;  %v464_v9 = vld [vmem:[%s2193_s3] sm:$0xff] (!%p212_p3)  ;;  %v465_v11 = vld [vmem:[%s2193_s3 + $0x8] sm:$0xff] (!%p212_p3)  ;;  %v1608_v13 = vld [vmem:[%s2191_s1 + $0x10] sm:$0xff] (!%p212_p3)   ;;  %v1639_v31 = vmov (!%p212_p3), 1.0|1.0  }
   0x8   : > { %1604 = vset.pattern.permute.xlu0 (!%p212_p3), %v1638_v1  ;;  %492 = vperm.xlu1 (!%p212_p3), %1605, %v466_v8   ;;  %v1607_v12 = vld [vmem:[%s2191_s1 + $0x8] sm:$0xff] (!%p212_p3)   ;;  %v468_v15 = vld [vmem:[%s2193_s3 + $0x20] sm:$0xff] (!%p212_p3)  ;;  %v471_v16 = vld [vmem:[%s2193_s3 + $0x38] sm:$0xff] (!%p212_p3)  ;;  %vm609_vm1 = vcmask (!%p212_p3), 130048  }
   0x9   : > { %482 = vperm.xlu0 (!%p212_p3), %1604, %v464_v9   ;;  %v469_v14 = vld [vmem:[%s2193_s3 + $0x28] sm:$0xff] (!%p212_p3)  ;;  %v470_v17 = vld [vmem:[%s2193_s3 + $0x30] sm:$0xff] (!%p212_p3)  ;;  %v1609_v18 = vld [vmem:[%s2191_s1 + $0x18] sm:$0xff] (!%p212_p3)   ;;  %1573 = vmatprep.subr.bf16.mxu0 (!%p212_p3), %v1639_v31 }
   0xa   : > { %v1610_v19 = vld [vmem:[%s2191_s1 + $0x20] sm:$0xff] (!%p212_p3)   ;;  %v473_v20 = vld [vmem:[%s2193_s3 + $0x48] sm:$0xff] (!%p212_p3)  ;;  %v475_v22 = vld [vmem:[%s2193_s3 + $0x58] sm:$0xff] (!%p212_p3)  ;;  %1574 = vmatpush3.bf16.msra.mxu0 (!%p212_p3), %v1639_v31 }
   0xb   : > { %v472_v21 = vld [vmem:[%s2193_s3 + $0x40] sm:$0xff] (!%p212_p3)  ;;  %v474_v23 = vld [vmem:[%s2193_s3 + $0x50] sm:$0xff] (!%p212_p3)  ;;  %v1611_v24 = vld [vmem:[%s2191_s1 + $0x28] sm:$0xff] (!%p212_p3)  }
   0xc   : > { %497 = vperm.xlu1 (!%p212_p3), %1605, %v467_v10   ;;  %v1612_v25 = vld [vmem:[%s2191_s1 + $0x30] sm:$0xff] (!%p212_p3)   ;;  %v477_v26 = vld [vmem:[%s2193_s3 + $0x68] sm:$0xff] (!%p212_p3)  ;;  %v476_v27 = vld [vmem:[%s2193_s3 + $0x60] sm:$0xff] (!%p212_p3) }
   0xd   : > { %487 = vperm.xlu0 (!%p212_p3), %1604, %v465_v11   ;;  %v479_v28 = vld [vmem:[%s2193_s3 + $0x78] sm:$0xff] (!%p212_p3)  ;;  %v478_v29 = vld [vmem:[%s2193_s3 + $0x70] sm:$0xff] (!%p212_p3)  ;;  %v764_v34 = vld [vmem:[%s2192_s2] sm:$0xff] (!%p212_p3) }
   0xe   : > { %s2205_s18 = smov (!%p254_p4, %s1628_s18), 1  ;;  %v1613_v30 = vld [vmem:[%s2191_s1 + $0x38] sm:$0xff]  }
   0xf   : > { %s1404_s24 = sshll.u32 %s2205_s18, 5 }
  0x10   : > { %s261_s27 = scalar_lea.vmem %s2190_s0, %s1404_s24  ;;  %507 = vperm.xlu1 %1605, %v469_v14   ;;  %s269_s23 = scalar_lea.vmem %s2194_s4, %s1404_s24 }
  0x11   : > { %v1701_v2 = vld [vmem:[%s261_s27] sm:$0xff]  ;;  %v1703_v3 = vld [vmem:[%s261_s27 + $0x8] sm:$0xff]  ;;  %v1705_v4 = vld [vmem:[%s261_s27 + $0x10] sm:$0xff]  ;;  %502 = vperm.xlu0 %1604, %v468_v15   ;;  %s1406_s24 = sshll.u32 %s2205_s18, 7 }
  0x12   : > { %v300_v5 = vpack.c.bf16 %v1703_v3, %v1701_v2  ;;  %v1709_v6 = vld [vmem:[%s261_s27 + $0x18] sm:$0xff]  ;;  %s2131_s27 = scalar_lea.vmem %s2195_s5, %s1406_s24 }
  0x13   : > { %v301_v7 = vpack.c.bf16 %v1709_v6, %v1705_v4 }
  0x14   : > { %1455 = vmatprep.subr.bf16.mxu1 %v300_v5  ;;  %517 = vperm.xlu1 %1605, %v471_v16  }
  0x15   : > { %1456 = vmatpush3.bf16.msra.mxu1 %v300_v5  ;;  %512 = vperm.xlu0 %1604, %v470_v17  }
  0x16   : > { %1457 = vmatprep.subr.bf16.mxu1 %v301_v7 }
  0x18   : > { %527 = vperm.xlu1 %1605, %v473_v20  }
  0x19   : > { %1458 = vmatpush3.bf16.msra.mxu1 %v301_v7  ;;  %522 = vperm.xlu0 %1604, %v472_v21  }
  0x1c   : > { %1460 = vmatmul.mubr.msk.bf16.vlgmr.msra.gmra.mrb[0].mxu1 %vm342_vm0, %v1607_v12  ;;  %537 = vperm.xlu1 %1605, %v475_v22  }
  0x1d   : > { %1463 = vmatprep.mubr.msk.bf16.mxu1 %vm342_vm0, %v1608_v13  ;;  %532 = vperm.xlu0 %1604, %v474_v23  }
  0x20   : > { %547 = vperm.xlu1 %1605, %v477_v26  }
  0x21   : > { %542 = vperm.xlu0 %1604, %v476_v27  }
  0x24   : > { %1464 = vmatmul.mubr.msk.bf16.gmra.mrb[4].mxu1 %vm342_vm0, %v1609_v18  ;;  %557 = vperm.xlu1 %1605, %v479_v28  }
  0x25   : > { %1467 = vmatprep.mubr.msk.bf16.mxu1 %vm342_vm0, %v1610_v19  ;;  %552 = vperm.xlu0 %1604, %v478_v29  }
  0x2c   : > { %1468 = vmatmul.mubr.msk.bf16.gmra.mrb[8].mxu1 %vm342_vm0, %v1611_v24 }
  0x2d   : > { %1471 = vmatprep.mubr.msk.bf16.mxu1 %vm342_vm0, %v1612_v25 }
  0x34   : > { %1472 = vmatmul.mubr.msk.bf16.gmra.mrb[12].mxu1 %vm342_vm0, %v1613_v30 }
  0x35   : > { %1507 = vmatprep.mubr.f32.mxu1 %v764_v34 }
  0x87   : > { %v493_v33 = vpop.permute.xlu1 %492 }
  0x88   : > { %v483_v32 = vpop.permute.xlu0 %482 }
  0x8b   : > { %v498_v36 = vpop.permute.xlu1 %497 }
  0x8c   : > { %v488_v35 = vpop.permute.xlu0 %487 }
  0x8f   : > { %v508_v38 = vpop.permute.xlu1 %507 }
  0x90   : > { %v503_v37 = vpop.permute.xlu0 %502 }
  0x93   : > { %v518_v42 = vpop.permute.xlu1 %517 }
  0x94   : > { %v513_v39 = vpop.permute.xlu0 %512 }
  0x97   : > { %v528_v47 = vpop.permute.xlu1 %527 }
  0x98   : > { %v523_v45 = vpop.permute.xlu0 %522 }
  0x9b   : > { %v538_v8 = vpop.permute.xlu1 %537 }
  0x9c   : > { %v533_v60 = vpop.permute.xlu0 %532 }
  0x9f   : > { %v548_v22 = vpop.permute.xlu1 %547 }
  0xa0   : > { %v543_v16 = vpop.permute.xlu0 %542 }
  0xef   : > { %v1461_v40 = vpop.f32.mrb[0].mxu1 }
  0xf0   : > { %v401_v41 = vpop.f32.mrb[1].mxu1  ;;  %v1794_v46 = vsub.f32 %v493_v33, %v1461_v40 }
  0xf1   : > { %v1462_v43 = vpop.f32.mrb[2].mxu1  ;;  %v1796_v48 = vsub.f32 %v483_v32, %v401_v41  ;;  %v553_v32 = vpop.permute.xlu0 %552 }
  0xf2   : > { %v404_v44 = vpop.f32.mrb[3].mxu1  ;;  %v1798_v50 = vsub.f32 %v498_v36, %v1462_v43  ;;  %v612_v56 = vsel %vm609_vm1, %v1794_v46, inf  ;;  %v558_v36 = vpop.permute.xlu1 %557 }
  0xf3   : > { %v1802_v53 = vsub.f32 %v488_v35, %v404_v44  ;;  %v610_v61 = vsel %vm609_vm1, %v1796_v48, inf }
  0xf4   : > { %v613_v1 = vsel %vm609_vm1, %v1798_v50, inf }
  0xf5   : > { %v611_v9 = vsel %vm609_vm1, %v1802_v53, inf }
  0xf7   : > { %v1465_v49 = vpop.f32.mrb[4].mxu1 }
  0xf8   : > { %v1800_v51 = vsub.f32 %v513_v39, %v1465_v49  ;;  %v417_v52 = vpop.f32.mrb[5].mxu1  ;;  %v576_v49 = vlaneseq }
  0xf9   : > { %v1804_v54 = vsub.f32 %v503_v37, %v417_v52  ;;  %v1466_v55 = vpop.f32.mrb[6].mxu1 }
  0xfa   : > { %v618_v57 = vsel %vm609_vm1, %v1800_v51, inf  ;;  %v1810_v58 = vsub.f32 %v518_v42, %v1466_v55  ;;  %v420_v59 = vpop.f32.mrb[7].mxu1 }
  0xfb   : > { %v619_v62 = vmin.f32 %v612_v56, %v618_v57  ;;  %v614_v63 = vsel %vm609_vm1, %v1804_v54, inf  ;;  %v1816_v0 = vsub.f32 %v508_v38, %v420_v59  ;;  %v1856_v59 = vshrl.u32 %v576_v49, 7 }
  0xfc   : > { %v615_v5 = vmin.f32 %v610_v61, %v614_v63  ;;  %v620_v7 = vsel %vm609_vm1, %v1810_v58, inf }
  0xfd   : > { %v621_v10 = vmin.f32 %v613_v1, %v620_v7  ;;  %v616_v11 = vsel %vm609_vm1, %v1816_v0, inf  ;;  %v1862_v1 = vadd.s32 40, %v1856_v59  ;;  %v1865_v7 = vadd.s32 72, %v1856_v59 }
  0xfe   : > { %v617_v12 = vmin.f32 %v611_v9, %v616_v11 }
  0xff   : > { %v1469_v13 = vpop.f32.mrb[8].mxu1  ;;  %v598_v11 = vcvt.s32.f32 %v1862_v1 }
 0x100   : > { %v1826_v14 = vsub.f32 %v533_v60, %v1469_v13  ;;  %v433_v15 = vpop.f32.mrb[9].mxu1  ;;  %v1876_v13 = vadd.s32 24, %v1856_v59 }
 0x101   : > { %v1828_v17 = vsub.f32 %v523_v45, %v433_v15  ;;  %v1470_v18 = vpop.f32.mrb[10].mxu1  ;;  %v1879_v15 = vadd.s32 32, %v1856_v59 }
 0x102   : > { %v626_v19 = vsel %vm609_vm1, %v1826_v14, inf  ;;  %v1832_v20 = vsub.f32 %v538_v8, %v1470_v18  ;;  %v436_v21 = vpop.f32.mrb[11].mxu1  ;;  %v1868_v8 = vadd.s32 104, %v1856_v59  ;;  %v1882_v18 = vadd.s32 48, %v1856_v59 }
 0x103   : > { %v627_v23 = vmin.f32 %v619_v62, %v626_v19  ;;  %v622_v24 = vsel %vm609_vm1, %v1828_v17, inf  ;;  %v1836_v25 = vsub.f32 %v528_v47, %v436_v21  ;;  %v1859_v62 = vadd.s32 8, %v1856_v59 }
 0x104   : > { %v623_v26 = vmin.f32 %v615_v5, %v622_v24  ;;  %v628_v27 = vsel %vm609_vm1, %v1832_v20, inf  ;;  %v1885_v19 = vadd.s32 56, %v1856_v59  ;;  %v1888_v21 = vadd.s32 64, %v1856_v59 }
 0x105   : > { %v629_v28 = vmin.f32 %v621_v10, %v628_v27  ;;  %v624_v29 = vsel %vm609_vm1, %v1836_v25, inf  ;;  %v594_v9 = vcvt.s32.f32 %v1859_v62  ;;  %v1897_v24 = vadd.s32 96, %v1856_v59 }
 0x106   : > { %v625_v30 = vmin.f32 %v617_v12, %v624_v29  ;;  %v1873_v12 = vadd.s32 16, %v1856_v59  ;;  %v602_v27 = vcvt.s32.f32 %v1865_v7 }
 0x107   : > { %v1473_v33 = vpop.f32.mrb[12].mxu1 }
 0x108   : > { %v1842_v34 = vsub.f32 %v553_v32, %v1473_v33  ;;  %v449_v35 = vpop.f32.mrb[13].mxu1  ;;  %v593_v32 = vcvt.s32.f32 %v1856_v59  ;;  %v595_v33 = vcvt.s32.f32 %v1873_v12 }
 0x109   : > { %v1844_v37 = vsub.f32 %v543_v16, %v449_v35  ;;  %v1474_v38 = vpop.f32.mrb[14].mxu1  ;;  %v596_v35 = vcvt.s32.f32 %v1876_v13 }
 0x10a   : > { %v634_v39 = vsel %vm609_vm1, %v1842_v34, inf  ;;  %v1848_v40 = vsub.f32 %v558_v36, %v1474_v38  ;;  %v452_v41 = vpop.f32.mrb[15].mxu1  ;;  %v597_v36 = vcvt.s32.f32 %v1879_v15 }
 0x10b   : > { %v635_v42 = vmin.f32 %v627_v23, %v634_v39  ;;  %v630_v43 = vsel %vm609_vm1, %v1844_v37, inf  ;;  %v573_v44 = vsub.f32 %v548_v22, %v452_v41  ;;  %v1891_v22 = vadd.s32 80, %v1856_v59 }
 0x10c   : > { %v631_v45 = vmin.f32 %v623_v26, %v630_v43  ;;  %v636_v47 = vsel %vm609_vm1, %v1848_v40, inf  ;;  %v1894_v23 = vadd.s32 88, %v1856_v59  ;;  %v1900_v26 = vadd.s32 112, %v1856_v59 }
 0x10d   : > { %v637_v52 = vmin.f32 %v629_v28, %v636_v47  ;;  %v632_v55 = vsel %vm609_vm1, %v573_v44, inf  ;;  %v606_v28 = vcvt.s32.f32 %v1868_v8  ;;  %v599_v39 = vcvt.s32.f32 %v1882_v18 }
 0x10e   : > { %v633_v56 = vmin.f32 %v625_v30, %v632_v55  ;;  %v1905_v30 = vadd.s32 120, %v1856_v59  ;;  %v600_v41 = vcvt.s32.f32 %v1885_v19  ;;  %v603_v43 = vcvt.s32.f32 %v1891_v22 }
 0x10f   : > { %v639_v57 = vmin.f32 %v635_v42, %v637_v52  ;;  %v601_v42 = vcvt.s32.f32 %v1888_v21  ;;  %v605_v47 = vcvt.s32.f32 %v1897_v24  ;;  %v607_v52 = vcvt.s32.f32 %v1900_v26  ;;  %v765_v26 = vld [vmem:[%s2192_s2 + $0x8] sm:$0xff] }
 0x110   : > { %v638_v60 = vmin.f32 %v631_v45, %v633_v56  ;;  %v604_v45 = vcvt.s32.f32 %v1894_v23  ;;  %v1640_v59 = vmov 0.0  }
 0x112   : > { %v640_v61 = vmin.f32 %v638_v60, %v639_v57 }
 0x114   : > { %v641_v63 = vrot.slane %v640_v61, 4 }
 0x116   : > { %v642_v5 = vmin.f32 %v640_v61, %v641_v63 }
 0x118   : > { %v643_v10 = vrot.slane %v642_v5, 2 }
 0x11a   : > { %v644_v16 = vmin.f32 %v642_v5, %v643_v10 }
 0x11c   : > { %v645_v29 = vrot.slane %v644_v16, 1 }
 0x11e   : > { %v646_v38 = vmin.f32 %v644_v16, %v645_v29 }
 0x120   : > { %vm648_vm2 = vcmp.eq.f32.partialorder %v1802_v53, %v646_v38  ;;  %vm652_vm3 = vcmp.eq.f32.partialorder %v1816_v0, %v646_v38  ;;  %vm656_vm4 = vcmp.eq.f32.partialorder %v1836_v25, %v646_v38  ;;  %vm660_vm5 = vcmp.eq.f32.partialorder %v573_v44, %v646_v38 }
 0x121   : > { %v664_v55 = vsel %vm648_vm2, %v594_v9, 128.0  ;;  %v668_v56 = vsel %vm652_vm3, %v598_v11, 128.0  ;;  %v672_v57 = vsel %vm656_vm4, %v602_v27, 128.0  ;;  %v676_v60 = vsel %vm660_vm5, %v606_v28, 128.0 }
 0x122   : > { %v680_v61 = vsel %vm609_vm1, %v664_v55, inf  ;;  %v685_v53 = vsel %vm609_vm1, %v668_v56, inf  ;;  %v693_v0 = vsel %vm609_vm1, %v672_v57, inf  ;;  %v701_v25 = vsel %vm609_vm1, %v676_v60, inf }
 0x123   : > { %v686_v44 = vmin.f32 %v680_v61, %v685_v53  ;;  %vm647_vm6 = vcmp.eq.f32.partialorder %v1796_v48, %v646_v38  ;;  %vm649_vm7 = vcmp.eq.f32.partialorder %v1794_v46, %v646_v38  ;;  %vm650_vm8 = vcmp.eq.f32.partialorder %v1798_v50, %v646_v38 }
 0x124   : > { %vm651_vm9 = vcmp.eq.f32.partialorder %v1804_v54, %v646_v38  ;;  %vm653_vm10 = vcmp.eq.f32.partialorder %v1800_v51, %v646_v38  ;;  %vm654_vm11 = vcmp.eq.f32.partialorder %v1810_v58, %v646_v38  ;;  %vm655_vm12 = vcmp.eq.f32.partialorder %v1828_v17, %v646_v38 }
 0x125   : > { %v694_v63 = vmin.f32 %v686_v44, %v693_v0  ;;  %vm657_vm13 = vcmp.eq.f32.partialorder %v1826_v14, %v646_v38  ;;  %vm658_vm14 = vcmp.eq.f32.partialorder %v1832_v20, %v646_v38  ;;  %vm659_vm15 = vcmp.eq.f32.partialorder %v1844_v37, %v646_v38 }
 0x126   : > { %vm661_vm0 = vcmp.eq.f32.partialorder %v1842_v34, %v646_v38  ;;  %vm662_vm2 = vcmp.eq.f32.partialorder %v1848_v40, %v646_v38  ;;  %v663_v46 = vsel %vm647_vm6, %v593_v32, 128.0  ;;  %v665_v48 = vsel %vm649_vm7, %v595_v33, 128.0 }
 0x127   : > { %v702_v50 = vmin.f32 %v694_v63, %v701_v25  ;;  %v666_v51 = vsel %vm650_vm8, %v596_v35, 128.0  ;;  %v667_v54 = vsel %vm651_vm9, %v597_v36, 128.0  ;;  %v669_v58 = vsel %vm653_vm10, %v599_v39, 128.0 }
 0x128   : > { %v608_v14 = vcvt.s32.f32 %v1905_v30  ;;  %v670_v17 = vsel %vm654_vm11, %v600_v41, 128.0  ;;  %v671_v20 = vsel %vm655_vm12, %v601_v42, 128.0  ;;  %v673_v37 = vsel %vm657_vm13, %v603_v43, 128.0 }
 0x129   : > { %v674_v5 = vsel %vm658_vm14, %v604_v45, 128.0  ;;  %v675_v10 = vsel %vm659_vm15, %v605_v47, 128.0  ;;  %v679_v16 = vsel %vm609_vm1, %v663_v46, inf  ;;  %v681_v29 = vsel %vm609_vm1, %v665_v48, inf }
 0x12a   : > { %v682_v55 = vsel %vm609_vm1, %v666_v51, inf  ;;  %v683_v56 = vsel %vm609_vm1, %v667_v54, inf  ;;  %v687_v57 = vsel %vm609_vm1, %v669_v58, inf  ;;  %v677_v60 = vsel %vm661_vm0, %v607_v52, 128.0 }
 0x12b   : > { %v684_v61 = vmin.f32 %v679_v16, %v683_v56  ;;  %v688_v53 = vmin.f32 %v681_v29, %v687_v57  ;;  %v689_v0 = vsel %vm609_vm1, %v670_v17, inf  ;;  %v678_v25 = vsel %vm662_vm2, %v608_v14, 128.0 }
 0x12c   : > { %v690_v44 = vmin.f32 %v682_v55, %v689_v0  ;;  %v691_v63 = vsel %vm609_vm1, %v671_v20, inf  ;;  %v695_v46 = vsel %vm609_vm1, %v673_v37, inf  ;;  %v697_v54 = vsel %vm609_vm1, %v674_v5, inf }
 0x12d   : > { %v692_v48 = vmin.f32 %v684_v61, %v691_v63  ;;  %v696_v51 = vmin.f32 %v688_v53, %v695_v46  ;;  %v699_v58 = vsel %vm609_vm1, %v675_v10, inf  ;;  %v703_v16 = vsel %vm609_vm1, %v677_v60, inf }
 0x12e   : > { %v698_v34 = vmin.f32 %v690_v44, %v697_v54  ;;  %v705_v56 = vsel %vm609_vm1, %v678_v25, inf }
 0x12f   : > { %v700_v17 = vmin.f32 %v692_v48, %v699_v58  ;;  %v704_v29 = vmin.f32 %v696_v51, %v703_v16 }
 0x130   : > { %v706_v40 = vmin.f32 %v698_v34, %v705_v56 }
 0x131   : > { %v707_v38 = vmin.f32 %v700_v17, %v702_v50 }
 0x132   : > { %v708_v55 = vmin.f32 %v704_v29, %v706_v40 }
 0x134   : > { %v709_v57 = vmin.f32 %v707_v38, %v708_v55 }
 0x136   : > { %v710_v20 = vrot.slane %v709_v57, 4 }
 0x138   : > { %v711_v0 = vmin.f32 %v709_v57, %v710_v20 }
 0x13a   : > { %v712_v37 = vrot.slane %v711_v0, 2 }
 0x13c   : > { %v713_v61 = vmin.f32 %v711_v0, %v712_v37 }
 0x13e   : > { %v714_v53 = vrot.slane %v713_v61, 1 }
 0x140   : > { %v1986_v63 = vmin.f32 %v713_v61, %v714_v53 }
 0x142   : > { %vm716_vm3 = vcmp.eq.f32.partialorder %v593_v32, %v1986_v63  ;;  %vm717_vm4 = vcmp.eq.f32.partialorder %v594_v9, %v1986_v63  ;;  %vm1997_vm5 = vcmp.eq.f32.partialorder %v595_v33, %v1986_v63  ;;  %vm2004_vm6 = vcmp.eq.f32.partialorder %v596_v35, %v1986_v63 }
 0x143   : > { %vm1541_vm7 = vmpackc.low %vm717_vm4, %vm716_vm3  ;;  %v1354_v32 = vsel %vm716_vm3, 1.0, %v1640_v59  ;;  %v1355_v62 = vsel %vm717_vm4, 1.0, %v1640_v59  ;;  %v1356_v9 = vsel %vm1997_vm5, 1.0, %v1640_v59  ;;  %vm720_vm9 = vcmp.eq.f32.partialorder %v597_v36, %v1986_v63 }
 0x144   : > { %1542 = vmatprep.subr.msk.bf16.mxu1 %vm1541_vm7, %v1639_v31  ;;  %1517 = vmatprep.mubr.msk.f32.mxu0 %vm609_vm1, %v1354_v32  ;;  %vm1545_vm8 = vmpackc.low %vm2004_vm6, %vm1997_vm5  ;;  %vm721_vm10 = vcmp.eq.f32.partialorder %v598_v11, %v1986_v63  ;;  %v1357_v12 = vsel %vm2004_vm6, 1.0, %v1640_v59  ;;  %v1358_v13 = vsel %vm720_vm9, 1.0, %v1640_v59  ;;  %vm722_vm12 = vcmp.eq.f32.partialorder %v599_v39, %v1986_v63 }
 0x145   : > { %1544 = vmatpush3.bf16.msk.msra.mxu1 %vm1541_vm7, %v1639_v31  ;;  %1518 = vmatmul.mubr.msk.f32.vlgmr.msra.gmra.mrb[0].mxu0 %vm609_vm1, %v1355_v62  ;;  %vm1549_vm11 = vmpackc.low %vm721_vm10, %vm720_vm9  ;;  %vm723_vm13 = vcmp.eq.f32.partialorder %v600_v41, %v1986_v63  ;;  %v1359_v1 = vsel %vm721_vm10, 1.0, %v1640_v59  ;;  %v1360_v11 = vsel %vm722_vm12, 1.0, %v1640_v59  ;;  %vm724_vm15 = vcmp.eq.f32.partialorder %v601_v42, %v1986_v63 }
 0x146   : > { %1546 = vmatprep.subr.msk.bf16.mxu1 %vm1545_vm8, %v1639_v31  ;;  %1520 = vmatprep.mubr.msk.f32.mxu0 %vm609_vm1, %v1356_v9  ;;  %vm1553_vm14 = vmpackc.low %vm723_vm13, %vm722_vm12  ;;  %vm725_vm0 = vcmp.eq.f32.partialorder %v602_v27, %v1986_v63  ;;  %v1361_v15 = vsel %vm723_vm13, 1.0, %v1640_v59  ;;  %v1362_v18 = vsel %vm724_vm15, 1.0, %v1640_v59  ;;  %vm726_vm3 = vcmp.eq.f32.partialorder %v603_v43, %v1986_v63  ;;  %v766_v27 = vld [vmem:[%s2192_s2 + $0x10] sm:$0xff] }
 0x147   : > { %vm1557_vm2 = vmpackc.low %vm725_vm0, %vm724_vm15  ;;  %vm727_vm4 = vcmp.eq.f32.partialorder %v604_v45, %v1986_v63  ;;  %v1363_v7 = vsel %vm725_vm0, 1.0, %v1640_v59  ;;  %v1364_v19 = vsel %vm726_vm3, 1.0, %v1640_v59  ;;  %vm728_vm6 = vcmp.eq.f32.partialorder %v605_v47, %v1986_v63 }
 0x148   : > { %vm1561_vm5 = vmpackc.low %vm727_vm4, %vm726_vm3  ;;  %vm729_vm7 = vcmp.eq.f32.partialorder %v606_v28, %v1986_v63  ;;  %v1365_v21 = vsel %vm727_vm4, 1.0, %v1640_v59  ;;  %v1366_v22 = vsel %vm728_vm6, 1.0, %v1640_v59  ;;  %vm730_vm9 = vcmp.eq.f32.partialorder %v607_v52, %v1986_v63  ;;  %v767_v28 = vld [vmem:[%s2192_s2 + $0x18] sm:$0xff] }
 0x149   : > { %1548 = vmatpush3.bf16.msk.msra.mxu1 %vm1545_vm8, %v1639_v31  ;;  %1521 = vmatmul.mubr.msk.f32.gmra.mrb[2].mxu0 %vm609_vm1, %v1357_v12  ;;  %vm1565_vm8 = vmpackc.low %vm729_vm7, %vm728_vm6  ;;  %vm731_vm10 = vcmp.eq.f32.partialorder %v608_v14, %v1986_v63  ;;  %v1367_v8 = vsel %vm729_vm7, 1.0, %v1640_v59  ;;  %v1368_v23 = vsel %vm730_vm9, 1.0, %v1640_v59  ;;  %vm1174_vm12 = vcmask 64512  }
 0x14a   : > { %1550 = vmatprep.subr.msk.bf16.mxu1 %vm1549_vm11, %v1639_v31  ;;  %1523 = vmatprep.mubr.msk.f32.mxu0 %vm609_vm1, %v1358_v13  ;;  %v1369_v24 = vsel %vm731_vm10, 1.0, %v1640_v59 }
 0x14d   : > { %1552 = vmatpush3.bf16.msk.msra.mxu1 %vm1549_vm11, %v1639_v31  ;;  %1524 = vmatmul.mubr.msk.f32.gmra.mrb[4].mxu0 %vm609_vm1, %v1359_v1  ;;  %vm1569_vm11 = vmpackc.low %vm731_vm10, %vm730_vm9 }
 0x14e   : > { %1554 = vmatprep.subr.msk.bf16.mxu1 %vm1553_vm14, %v1639_v31  ;;  %1526 = vmatprep.mubr.msk.f32.mxu0 %vm609_vm1, %v1360_v11 }
 0x151   : > { %1556 = vmatpush3.bf16.msk.msra.mxu1 %vm1553_vm14, %v1639_v31  ;;  %1527 = vmatmul.mubr.msk.f32.gmra.mrb[6].mxu0 %vm609_vm1, %v1361_v15 }
 0x152   : > { %1558 = vmatprep.subr.msk.bf16.mxu1 %vm1557_vm2, %v1639_v31  ;;  %1529 = vmatprep.mubr.msk.f32.mxu0 %vm609_vm1, %v1362_v18 }
 0x155   : > { %1560 = vmatpush3.bf16.msk.msra.mxu1 %vm1557_vm2, %v1639_v31  ;;  %1530 = vmatmul.mubr.msk.f32.gmra.mrb[8].mxu0 %vm609_vm1, %v1363_v7 }
 0x156   : > { %1562 = vmatprep.subr.msk.bf16.mxu1 %vm1561_vm5, %v1639_v31  ;;  %1532 = vmatprep.mubr.msk.f32.mxu0 %vm609_vm1, %v1364_v19  ;;  %v1075_v19 = vand.u32 127, %v576_v49 }
 0x159   : > { %1564 = vmatpush3.bf16.msk.msra.mxu1 %vm1561_vm5, %v1639_v31  ;;  %1533 = vmatmul.mubr.msk.f32.gmra.mrb[10].mxu0 %vm609_vm1, %v1365_v21 }
 0x15a   : > { %1566 = vmatprep.subr.msk.bf16.mxu1 %vm1565_vm8, %v1639_v31  ;;  %1535 = vmatprep.mubr.msk.f32.mxu0 %vm609_vm1, %v1366_v22 }
 0x15d   : > { %1568 = vmatpush3.bf16.msk.msra.mxu1 %vm1565_vm8, %v1639_v31  ;;  %1536 = vmatmul.mubr.msk.f32.gmra.mrb[12].mxu0 %vm609_vm1, %v1367_v8 }
 0x15e   : > { %1570 = vmatprep.subr.msk.bf16.mxu1 %vm1569_vm11, %v1639_v31  ;;  %1538 = vmatprep.mubr.msk.f32.mxu0 %vm609_vm1, %v1368_v23 }
 0x161   : > { %1572 = vmatpush3.bf16.msk.msra.mxu1 %vm1569_vm11, %v1639_v31  ;;  %1539 = vmatmul.mubr.msk.f32.gmra.mrb[14].mxu0 %vm609_vm1, %v1369_v24 }
 0x164   : > { %1508 = vmatmul.mubr.f32.vlgmr.msra.gmra.mrb[16].mxu1 %v765_v26 }
 0x165   : > { %1510 = vmatprep.mubr.f32.mxu1 %v766_v27 }
 0x168   : > { %1511 = vmatmul.mubr.f32.gmra.mrb[18].mxu1 %v767_v28 }
 0x218   : > { %v1519_v30 = vpop.f32.mrb[0].mxu0 }
 0x219   : > { %v975_v33 = vpop.f32.mrb[1].mxu0 }
 0x21a   : > { %1079 = vperm.xlu1 %1605, %v975_v33  }
 0x21c   : > { %v1522_v31 = vpop.f32.mrb[2].mxu0 }
 0x21d   : > { %v985_v35 = vpop.f32.mrb[3].mxu0 }
 0x21e   : > { %1084 = vperm.xlu1 %1605, %v1519_v30  }
 0x220   : > { %v1525_v36 = vpop.f32.mrb[4].mxu0 }
 0x221   : > { %v995_v39 = vpop.f32.mrb[5].mxu0 }
 0x222   : > { %1089 = vperm.xlu1 %1605, %v985_v35  }
 0x224   : > { %v1528_v41 = vpop.f32.mrb[6].mxu0 }
 0x225   : > { %v1005_v42 = vpop.f32.mrb[7].mxu0 }
 0x226   : > { %1094 = vperm.xlu1 %1605, %v1522_v31  }
 0x228   : > { %v1531_v43 = vpop.f32.mrb[8].mxu0 }
 0x229   : > { %v1015_v45 = vpop.f32.mrb[9].mxu0 }
 0x22a   : > { %1099 = vperm.xlu1 %1605, %v995_v39  }
 0x22c   : > { %v1534_v47 = vpop.f32.mrb[10].mxu0 }
 0x22d   : > { %v1025_v52 = vpop.f32.mrb[11].mxu0 }
 0x22e   : > { %1104 = vperm.xlu1 %1605, %v1525_v36  }
 0x230   : > { %v1537_v14 = vpop.f32.mrb[12].mxu0 }
 0x231   : > { %v1035_v10 = vpop.f32.mrb[13].mxu0 }
 0x232   : > { %1109 = vperm.xlu1 %1605, %v1005_v42  }
 0x234   : > { %v1540_v60 = vpop.f32.mrb[14].mxu0 }
 0x235   : > { %v1045_v25 = vpop.f32.mrb[15].mxu0 }
 0x236   : > { %1114 = vperm.xlu1 %1605, %v1528_v41  }
 0x237   : > { %v1509_v44 = vpop.f32.mrb[16].mxu1 }
 0x238   : > { %854 = vst.msk [vmem:[%s269_s23 + $0x8] sm:$0xff] %vm609_vm1, %v1509_v44  ;;  %v858_v46 = vsub.f32 %v1703_v3, %v1509_v44  ;;  %v834_v48 = vpop.f32.mrb[17].mxu1 }
 0x239   : > { %853 = vst.msk [vmem:[%s269_s23] sm:$0xff] %vm609_vm1, %v834_v48  ;;  %v857_v51 = vsub.f32 %v1701_v2, %v834_v48 }
 0x23a   : > { %v1055_v54 = vmul.f32 %v858_v46, %v858_v46  ;;  %1124 = vperm.xlu1 %1605, %v1531_v43  }
 0x23b   : > { %v1054_v34 = vmul.f32 %v857_v51, %v857_v51  ;;  %v1512_v58 = vpop.f32.mrb[18].mxu1 }
 0x23c   : > { %v1059_v16 = vsel %vm609_vm1, %v1055_v54, 0.0  ;;  %856 = vst.msk [vmem:[%s269_s23 + $0x18] sm:$0xff] %vm609_vm1, %v1512_v58  ;;  %v860_v17 = vsub.f32 %v1709_v6, %v1512_v58  ;;  %v844_v29 = vpop.f32.mrb[19].mxu1 }
 0x23d   : > { %v1058_v56 = vsel %vm609_vm1, %v1054_v34, 0.0  ;;  %855 = vst.msk [vmem:[%s269_s23 + $0x10] sm:$0xff] %vm609_vm1, %v844_v29  ;;  %v859_v3 = vsub.f32 %v1705_v4, %v844_v29 }
 0x23e   : > { %v1060_v40 = vadd.f32 %v1059_v16, %v1058_v56  ;;  %1129 = vperm.xlu1 %1605, %v1025_v52   ;;  %v1057_v2 = vmul.f32 %v860_v17, %v860_v17 }
 0x23f   : > { %v1056_v38 = vmul.f32 %v859_v3, %v859_v3 }
 0x240   : > { %v1063_v20 = vsel %vm609_vm1, %v1057_v2, 0.0 }
 0x241   : > { %v1061_v55 = vsel %vm609_vm1, %v1056_v38, 0.0  ;;  %vm1076_vm1 = vcmp.eq.s32.totalorder %v1075_v19, 0 }
 0x242   : > { %1134 = vperm.xlu1 %1605, %v1534_v47   ;;  %v1062_v57 = vadd.f32 %v1061_v55, %v1060_v40 }
 0x244   : > { %v1064_v0 = vadd.f32 %v1063_v20, %v1062_v57 }
 0x246   : > { %1065 = vadd.xlane.f32.xlu0 %v1064_v0  ;;  %1139 = vperm.xlu1 %1605, %v1035_v10  }
 0x24a   : > { %1144 = vperm.xlu1 %1605, %v1537_v14  }
 0x24e   : > { %1149 = vperm.xlu1 %1605, %v1045_v25  }
 0x25c   : > { %1119 = vperm.xlu0 %1604, %v1015_v45  }
 0x260   : > { %1154 = vperm.xlu0 %1604, %v1540_v60  }
 0x299   : > { %v1080_v6 = vpop.permute.xlu1 %1079 }
 0x29d   : > { %v1085_v37 = vpop.permute.xlu1 %1084 }
 0x2a1   : > { %v1090_v4 = vpop.permute.xlu1 %1089 }
 0x2a5   : > { %v1095_v5 = vpop.permute.xlu1 %1094 }
 0x2a9   : > { %v1100_v9 = vpop.permute.xlu1 %1099 }
 0x2ad   : > { %v1105_v12 = vpop.permute.xlu1 %1104 }
 0x2b1   : > { %v1110_v13 = vpop.permute.xlu1 %1109 }
 0x2b5   : > { %v1115_v1 = vpop.permute.xlu1 %1114 }
 0x2b9   : > { %v1125_v11 = vpop.permute.xlu1 %1124 }
 0x2bd   : > { %v1130_v15 = vpop.permute.xlu1 %1129 }
 0x2c1   : > { %v1135_v18 = vpop.permute.xlu1 %1134 }
 0x2c5   : > { %v1140_v7 = vpop.permute.xlu1 %1139 }
 0x2c9   : > { %v1145_v21 = vpop.permute.xlu1 %1144 }
 0x2cd   : > { %v1150_v31 = vpop.permute.xlu1 %1149 }
 0x2d3   : > { %v1066_v61 = vpop.xlane.xlu0 %1065 }
 0x2d4   : > { %v1067_v53 = vrot.slane %v1066_v61, 4 }
 0x2d6   : > { %v1068_v63 = vadd.f32 %v1067_v53, %v1066_v61 }
 0x2d8   : > { %v1069_v50 = vrot.slane %v1068_v63, 2 }
 0x2da   : > { %v1070_v59 = vadd.f32 %v1069_v50, %v1068_v63 }
 0x2db   : > { %v1120_v22 = vpop.permute.xlu0 %1119 }
 0x2dc   : > { %v1071_v32 = vrot.slane %v1070_v59, 1 }
 0x2de   : > { %v1072_v62 = vadd.f32 %v1071_v32, %v1070_v59 }
 0x2df   : > { %v1155_v35 = vpop.permute.xlu0 %1154 }
 0x2e0   : > { %1575 = vpush %v1072_v62 }
 0x311   : > { %s1576_s28 = spop %1575 }
 0x312   : > { %v1157_v8 = vstv %s1576_s28 }
 0x313   : > { %v1158_v23 = vsel %vm1076_vm1, %v1080_v6, %v1157_v8  ;;  %v1159_v49 = vsel %vm1076_vm1, %v1085_v37, %v1157_v8  ;;  %v1160_v24 = vsel %vm1076_vm1, %v1090_v4, %v1157_v8  ;;  %v1161_v26 = vsel %vm1076_vm1, %v1095_v5, %v1157_v8 }
 0x314   : > { %v1162_v27 = vsel %vm1076_vm1, %v1100_v9, %v1157_v8  ;;  %v1163_v28 = vsel %vm1076_vm1, %v1105_v12, %v1157_v8  ;;  %v1164_v30 = vsel %vm1076_vm1, %v1110_v13, %v1157_v8  ;;  %v1165_v33 = vsel %vm1076_vm1, %v1115_v1, %v1157_v8  ;;  %1175 = vst.msk [vmem:[%s2131_s27] sm:$0xff] %vm1174_vm12, %v1158_v23 }
 0x315   : > { %1176 = vst.msk [vmem:[%s2131_s27 + $0x8] sm:$0xff] %vm1174_vm12, %v1159_v49  ;;  %1177 = vst.msk [vmem:[%s2131_s27 + $0x10] sm:$0xff] %vm1174_vm12, %v1160_v24  ;;  %v1166_v36 = vsel %vm1076_vm1, %v1120_v22, %v1157_v8  ;;  %v1167_v39 = vsel %vm1076_vm1, %v1125_v11, %v1157_v8  ;;  %v1168_v41 = vsel %vm1076_vm1, %v1130_v15, %v1157_v8 }
 0x316   : > { %1178 = vst.msk [vmem:[%s2131_s27 + $0x18] sm:$0xff] %vm1174_vm12, %v1161_v26  ;;  %v1169_v42 = vsel %vm1076_vm1, %v1135_v18, %v1157_v8  ;;  %1179 = vst.msk [vmem:[%s2131_s27 + $0x20] sm:$0xff] %vm1174_vm12, %v1162_v27  ;;  %v1170_v43 = vsel %vm1076_vm1, %v1140_v7, %v1157_v8  ;;  %v1171_v45 = vsel %vm1076_vm1, %v1145_v21, %v1157_v8 }
 0x317   : > { %1180 = vst.msk [vmem:[%s2131_s27 + $0x28] sm:$0xff] %vm1174_vm12, %v1163_v28  ;;  %1181 = vst.msk [vmem:[%s2131_s27 + $0x30] sm:$0xff] %vm1174_vm12, %v1164_v30  ;;  %v1172_v47 = vsel %vm1076_vm1, %v1150_v31, %v1157_v8  ;;  %v1173_v52 = vsel %vm1076_vm1, %v1155_v35, %v1157_v8 }
 0x318   : > { %1182 = vst.msk [vmem:[%s2131_s27 + $0x38] sm:$0xff] %vm1174_vm12, %v1165_v33  ;;  %1183 = vst.msk [vmem:[%s2131_s27 + $0x40] sm:$0xff] %vm1174_vm12, %v1166_v36 }
 0x319   : > { %1184 = vst.msk [vmem:[%s2131_s27 + $0x48] sm:$0xff] %vm1174_vm12, %v1167_v39  ;;  %1185 = vst.msk [vmem:[%s2131_s27 + $0x50] sm:$0xff] %vm1174_vm12, %v1168_v41 }
 0x31a   : > { %1186 = vst.msk [vmem:[%s2131_s27 + $0x58] sm:$0xff] %vm1174_vm12, %v1169_v42  ;;  %1187 = vst.msk [vmem:[%s2131_s27 + $0x60] sm:$0xff] %vm1174_vm12, %v1170_v43 }
 0x31b   : > { %1188 = vst.msk [vmem:[%s2131_s27 + $0x68] sm:$0xff] %vm1174_vm12, %v1171_v45  ;;  %1189 = vst.msk [vmem:[%s2131_s27 + $0x70] sm:$0xff] %vm1174_vm12, %v1172_v47 }
 0x31c   : > { %1190 = vst.msk [vmem:[%s2131_s27 + $0x78] sm:$0xff] %vm1174_vm12, %v1173_v52 }
 0x31d PF: > { %s16_s20 = sadd.s32 1, %s1636_s20   ;;  %s2200_s18 = smov %s1632_s19 }
 0x31e   : > { %p13_p5 = scmp.ge.s32.totalorder %s16_s20, 4   ;;  %s2201_s19 = smov %s2203_s21 }
 0x320   :  { %15 = sbr.rel (!%p13_p5) target bundleno = 2 (0x2), region = 78 }

</bundles_post_ra>
